<compile_context>
chip_gen: v6e
topology: v6e:2x2x1
jax: 0.10.0
libtpu: 0.0.40
codegen_flags: <defaults>
</compile_context>

<pallas_src>
import jax
import jax.numpy as jnp
from jax.experimental import pallas as pl
from jax.experimental.pallas import tpu as pltpu


def _round_up(x, m):
    return -(-x // m) * m


def encoder_lstm_kernel(gx_ref, whh_ref, ann_ref, h_ref, c_ref):
    """Whole-sequence LSTM recurrence for one batch block.

    gx_ref  : (S, BB, 4*Hp)  precomputed x @ W_ih^T + bias (gate order i,f,o,g)
    whh_ref : (Hp, 4*Hp)     W_hh^T (gate order i,f,o,g), resident in VMEM
    ann_ref : (S, BB, Hp)    per-timestep hidden states
    h_ref   : (BB, Hp)       final hidden (also used as the recurrent carry)
    c_ref   : (BB, Hp)       final cell   (also used as the recurrent carry)
    """
    S = gx_ref.shape[0]
    Hp = whh_ref.shape[0]
    whh = whh_ref[...]

    # Resident output blocks double as the recurrent carry.
    h_ref[...] = jnp.zeros_like(h_ref)
    c_ref[...] = jnp.zeros_like(c_ref)

    @pl.loop(0, S)
    def _(t):
        h = h_ref[...]
        c = c_ref[...]
        # Single per-step MXU matmul: h @ W_hh^T (f32 accumulate).
        gates = gx_ref[t].astype(jnp.float32) + jnp.dot(
            h.astype(whh.dtype), whh, preferred_element_type=jnp.float32)
        # Gate order (i, f, o, g): one sigmoid over 3*Hp lanes, one tanh over Hp.
        ifo = jax.nn.sigmoid(gates[:, : 3 * Hp])
        g = jnp.tanh(gates[:, 3 * Hp:])
        i_g = ifo[:, :Hp]
        f_g = ifo[:, Hp:2 * Hp]
        o_g = ifo[:, 2 * Hp:]
        c_new = f_g * c + i_g * g
        h_new = o_g * jnp.tanh(c_new)
        ann_ref[t] = h_new
        h_ref[...] = h_new
        c_ref[...] = c_new


def _reorder_gates_ifog(w):
    """Permute gate blocks along axis 0 from PyTorch (i,f,g,o) to (i,f,o,g)."""
    i, f, g, o = jnp.split(w, 4, axis=0)
    return jnp.concatenate([i, f, o, g], axis=0)


def _pad_gate_lanes(x, H, Hp):
    """Pad each of the 4 gate blocks along the last axis from H to Hp lanes."""
    parts = jnp.split(x, 4, axis=-1)
    pad = [(0, 0)] * (x.ndim - 1) + [(0, Hp - H)]
    return jnp.concatenate([jnp.pad(p, pad) for p in parts], axis=-1)


def encoder_forward(inputs, embedding, w_ih, w_hh, b_ih, b_hh,
                    *, compute_dtype=jnp.float32):
    """inputs: (B, S) int32; embedding: (V, H); w_ih/w_hh: (4H, H); b_*: (4H,).

    Returns (annotations (B,S,H), hidden (B,H), cell (B,H)) — matches the
    PyTorch Encoder.forward semantics.
    """
    B, S = inputs.shape
    H = embedding.shape[1]

    BB = 8                       # batch block (f32 sublane count)
    Hp = _round_up(H, 128)       # lane-aligned hidden size
    Bp = _round_up(B, BB)
    n_bblk = Bp // BB

    # --- plain-JAX glue: embedding gather + hoisted input projection ---------
    # TODO(synk): the embedding gather stays in plain JAX (data-dependent gather
    # has no clean rectangular-BlockSpec equivalent at this scale).
    encoded = jnp.take(embedding, inputs, axis=0)            # (B, S, H) f32

    w_ih_r = _reorder_gates_ifog(w_ih)                       # (4H, H), i,f,o,g
    w_hh_r = _reorder_gates_ifog(w_hh)
    bias_r = _reorder_gates_ifog(b_ih + b_hh)                # (4H,)

    # One big GEMM over all timesteps: gates_x = X @ W_ih^T + (b_ih + b_hh).
    x_flat = jnp.transpose(encoded, (1, 0, 2)).reshape(S * B, H)   # time-major
    gx = (x_flat @ w_ih_r.T + bias_r).reshape(S, B, 4 * H)          # (S, B, 4H)

    # Pad gate lanes (per gate block) and batch rows with zeros.  Zero bias /
    # zero weights in padded lanes keep padded h/c lanes identically zero.
    gx_p = _pad_gate_lanes(gx, H, Hp)                        # (S, B, 4Hp)
    gx_p = jnp.pad(gx_p, ((0, 0), (0, Bp - B), (0, 0)))      # (S, Bp, 4Hp)
    whh_t = _pad_gate_lanes(w_hh_r.T, H, Hp)                 # (H, 4Hp)
    whh_t = jnp.pad(whh_t, ((0, Hp - H), (0, 0)))            # (Hp, 4Hp)

    gx_p = gx_p.astype(compute_dtype)                        # bf16 OK on v6e/v7x
    whh_t = whh_t.astype(compute_dtype)

    # --- recurrent kernel: one invocation, grid over batch blocks ------------
    ann_p, h_p, c_p = pl.pallas_call(
        encoder_lstm_kernel,
        out_shape=(
            jax.ShapeDtypeStruct((S, Bp, Hp), jnp.float32),  # annotations (time-major)
            jax.ShapeDtypeStruct((Bp, Hp), jnp.float32),     # final hidden
            jax.ShapeDtypeStruct((Bp, Hp), jnp.float32),     # final cell
        ),
        grid_spec=pltpu.PrefetchScalarGridSpec(
            num_scalar_prefetch=0,
            grid=(n_bblk,),
            in_specs=[
                pl.BlockSpec((S, BB, 4 * Hp), lambda b: (0, b, 0)),  # x-gates stream
                pl.BlockSpec((Hp, 4 * Hp), lambda b: (0, 0)),        # W_hh^T resident
            ],
            out_specs=[
                pl.BlockSpec((S, BB, Hp), lambda b: (0, b, 0)),      # annotations
                pl.BlockSpec((BB, Hp), lambda b: (b, 0)),            # final h (carry)
                pl.BlockSpec((BB, Hp), lambda b: (b, 0)),            # final c (carry)
            ],
        ),
        compiler_params=pltpu.CompilerParams(
            # batch blocks are independent -> shard across TensorCores on v7x
            dimension_semantics=("parallel",),
        ),
    )(gx_p, whh_t)

    # Strip padding, return batch-major annotations.
    annotations = jnp.transpose(ann_p[:, :B, :H], (1, 0, 2))  # (B, S, H)
    return annotations, h_p[:B, :H], c_p[:B, :H]


def _reference_forward(inputs, embedding, w_ih, w_hh, b_ih, b_hh):
    """Pure-JAX reference matching PyTorch Embedding + LSTMCell semantics."""
    B, S = inputs.shape
    H = embedding.shape[1]
    encoded = jnp.take(embedding, inputs, axis=0)
    h = jnp.zeros((B, H), jnp.float32)
    c = jnp.zeros((B, H), jnp.float32)
    anns = []
    for t in range(S):
        x = encoded[:, t, :]
        gates = x @ w_ih.T + b_ih + h @ w_hh.T + b_hh
        i_g = jax.nn.sigmoid(gates[:, 0 * H:1 * H])
        f_g = jax.nn.sigmoid(gates[:, 1 * H:2 * H])
        g_g = jnp.tanh(gates[:, 2 * H:3 * H])
        o_g = jax.nn.sigmoid(gates[:, 3 * H:4 * H])
        c = f_g * c + i_g * g_g
        h = o_g * jnp.tanh(c)
        anns.append(h)
    return jnp.stack(anns, axis=1), h, c


if __name__ == "__main__":
    vocab_size, hidden_size = 20, 32
    batch_size, seq_len = 2, 8

    key = jax.random.PRNGKey(0)
    k_emb, k_wih, k_whh, k_bih, k_bhh, k_in = jax.random.split(key, 6)

    # Deterministic parameter init (shapes match nn.Embedding / nn.LSTMCell).
    bound = 1.0 / jnp.sqrt(hidden_size)
    embedding = jax.random.normal(k_emb, (vocab_size, hidden_size), jnp.float32)
    w_ih = jax.random.uniform(k_wih, (4 * hidden_size, hidden_size), jnp.float32, -bound, bound)
    w_hh = jax.random.uniform(k_whh, (4 * hidden_size, hidden_size), jnp.float32, -bound, bound)
    b_ih = jax.random.uniform(k_bih, (4 * hidden_size,), jnp.float32, -bound, bound)
    b_hh = jax.random.uniform(k_bhh, (4 * hidden_size,), jnp.float32, -bound, bound)

    inputs = jax.random.randint(k_in, (batch_size, seq_len), 0, vocab_size, jnp.int32)

    annotations, h_fin, c_fin = encoder_forward(
        inputs, embedding, w_ih, w_hh, b_ih, b_hh, compute_dtype=jnp.float32)
    jax.block_until_ready((annotations, h_fin, c_fin))

    # Sanity check against pure-JAX reference.
    ann_ref, h_ref, c_ref = _reference_forward(inputs, embedding, w_ih, w_hh, b_ih, b_hh)
    assert annotations.shape == (batch_size, seq_len, hidden_size)
    assert h_fin.shape == (batch_size, hidden_size)
    assert c_fin.shape == (batch_size, hidden_size)
    assert jnp.allclose(annotations, ann_ref, atol=1e-5)
    assert jnp.allclose(h_fin, h_ref, atol=1e-5)
    assert jnp.allclose(c_fin, c_ref, atol=1e-5)

    print("KERNEL_OK")
</pallas_src>

<mosaic_0001>
module attributes {stable_mosaic.version = 11 : i64} {
  func.func @encoder_lstm_kernel(%arg0: i32, %arg1: memref<8x8x512xf32, #tpu.memory_space<vmem>>, %arg2: memref<128x512xf32, #tpu.memory_space<vmem>>, %arg3: memref<8x8x128xf32, #tpu.memory_space<vmem>>, %arg4: memref<8x128xf32, #tpu.memory_space<vmem>>, %arg5: memref<8x128xf32, #tpu.memory_space<vmem>>) attributes {dimension_semantics = [#tpu.dimension_semantics<parallel>], iteration_bounds = array<i64: 1>, scalar_prefetch = 0 : i64, scratch_operands = 0 : i64, tpu.core_type = #tpu.core_type<tc>, window_params = [{transform_indices = @transform_0, window_bounds = array<i64: 8, 8, 512>}, {pipeline_mode = #tpu.pipeline_mode<synchronous>, transform_indices = @transform_1, window_bounds = array<i64: 128, 512>}, {transform_indices = @transform_2, window_bounds = array<i64: 8, 8, 128>}, {transform_indices = @transform_3, window_bounds = array<i64: 8, 128>}, {transform_indices = @transform_4, window_bounds = array<i64: 8, 128>}]} {
    %c0 = arith.constant 0 : index
    %c0_0 = arith.constant 0 : index
    %0 = vector.load %arg2[%c0, %c0_0] : memref<128x512xf32, #tpu.memory_space<vmem>>, vector<128x512xf32>
    %cst = arith.constant 0.000000e+00 : f32
    %1 = vector.broadcast %cst : f32 to vector<8x128xf32>
    %c0_1 = arith.constant 0 : index
    %c0_2 = arith.constant 0 : index
    %2 = vector.load %arg4[%c0_1, %c0_2] : memref<8x128xf32, #tpu.memory_space<vmem>>, vector<8x128xf32>
    tpu.vector_store %arg4[%c0_1, %c0_2], %1 {strides = array<i32>} : memref<8x128xf32, #tpu.memory_space<vmem>>, vector<8x128xf32>,
    %cst_3 = arith.constant 0.000000e+00 : f32
    %3 = vector.broadcast %cst_3 : f32 to vector<8x128xf32>
    %c0_4 = arith.constant 0 : index
    %c0_5 = arith.constant 0 : index
    %4 = vector.load %arg5[%c0_4, %c0_5] : memref<8x128xf32, #tpu.memory_space<vmem>>, vector<8x128xf32>
    tpu.vector_store %arg5[%c0_4, %c0_5], %3 {strides = array<i32>} : memref<8x128xf32, #tpu.memory_space<vmem>>, vector<8x128xf32>,
    %c0_i32 = arith.constant 0 : i32
    %c8_i32 = arith.constant 8 : i32
    %5 = arith.addi %c0_i32, %c8_i32 : i32
    %c1_i32 = arith.constant 1 : i32
    scf.for %arg6 = %c0_i32 to %5 step %c1_i32  : i32 {
      %c1_i32_7 = arith.constant 1 : i32
      %6 = arith.muli %arg6, %c1_i32_7 : i32
      %c0_i32_8 = arith.constant 0 : i32
      %7 = arith.addi %c0_i32_8, %6 : i32
      %c0_9 = arith.constant 0 : index
      %c0_10 = arith.constant 0 : index
      %8 = vector.load %arg4[%c0_9, %c0_10] : memref<8x128xf32, #tpu.memory_space<vmem>>, vector<8x128xf32>
      %c0_11 = arith.constant 0 : index
      %c0_12 = arith.constant 0 : index
      %9 = vector.load %arg5[%c0_11, %c0_12] : memref<8x128xf32, #tpu.memory_space<vmem>>, vector<8x128xf32>
      %10 = arith.index_cast %7 : i32 to index
      %c0_13 = arith.constant 0 : index
      %c0_14 = arith.constant 0 : index
      %11 = vector.load %arg1[%10, %c0_13, %c0_14] : memref<8x8x512xf32, #tpu.memory_space<vmem>>, vector<1x8x512xf32>
      %12 = vector.shape_cast %11 : vector<1x8x512xf32> to vector<8x512xf32>
      %cst_15 = arith.constant dense<0.000000e+00> : vector<8x512xf32>
      %13 = tpu.matmul %8, %0, %cst_15 {dimension_numbers = #tpu.dot_dimension_numbers<[1], [0], [0], [1], [0, 0, 1, 1], [], []>} : vector<8x128xf32>, vector<128x512xf32>, vector<8x512xf32> -> vector<8x512xf32>
      %14 = arith.addf %12, %13 : vector<8x512xf32>
      %15 = vector.extract_strided_slice %14 {offsets = [0, 0], sizes = [8, 384], strides = [1, 1]} : vector<8x512xf32> to vector<8x384xf32>
      %16 = arith.negf %15 : vector<8x384xf32>
      %17 = math.exp %16 : vector<8x384xf32>
      %cst_16 = arith.constant 1.000000e+00 : f32
      %18 = vector.broadcast %cst_16 : f32 to vector<8x384xf32>
      %19 = arith.addf %18, %17 : vector<8x384xf32>
      %20 = arith.divf %18, %19 : vector<8x384xf32>
      %21 = vector.extract_strided_slice %14 {offsets = [0, 384], sizes = [8, 128], strides = [1, 1]} : vector<8x512xf32> to vector<8x128xf32>
      %22 = math.tanh %21 : vector<8x128xf32>
      %23 = vector.extract_strided_slice %20 {offsets = [0, 0], sizes = [8, 128], strides = [1, 1]} : vector<8x384xf32> to vector<8x128xf32>
      %24 = vector.extract_strided_slice %20 {offsets = [0, 128], sizes = [8, 128], strides = [1, 1]} : vector<8x384xf32> to vector<8x128xf32>
      %25 = vector.extract_strided_slice %20 {offsets = [0, 256], sizes = [8, 128], strides = [1, 1]} : vector<8x384xf32> to vector<8x128xf32>
      %26 = arith.mulf %24, %9 : vector<8x128xf32>
      %27 = arith.mulf %23, %22 : vector<8x128xf32>
      %28 = arith.addf %26, %27 : vector<8x128xf32>
      %29 = math.tanh %28 : vector<8x128xf32>
      %30 = arith.mulf %25, %29 : vector<8x128xf32>
      %31 = arith.index_cast %7 : i32 to index
      %c0_17 = arith.constant 0 : index
      %c0_18 = arith.constant 0 : index
      %32 = vector.load %arg3[%31, %c0_17, %c0_18] : memref<8x8x128xf32, #tpu.memory_space<vmem>>, vector<1x8x128xf32>
      %33 = vector.shape_cast %32 : vector<1x8x128xf32> to vector<8x128xf32>
      %34 = vector.shape_cast %30 : vector<8x128xf32> to vector<1x8x128xf32>
      tpu.vector_store %arg3[%31, %c0_17, %c0_18], %34 {strides = array<i32>} : memref<8x8x128xf32, #tpu.memory_space<vmem>>, vector<1x8x128xf32>,
      %c0_19 = arith.constant 0 : index
      %c0_20 = arith.constant 0 : index
      %35 = vector.load %arg4[%c0_19, %c0_20] : memref<8x128xf32, #tpu.memory_space<vmem>>, vector<8x128xf32>
      tpu.vector_store %arg4[%c0_19, %c0_20], %30 {strides = array<i32>} : memref<8x128xf32, #tpu.memory_space<vmem>>, vector<8x128xf32>,
      %c0_21 = arith.constant 0 : index
      %c0_22 = arith.constant 0 : index
      %36 = vector.load %arg5[%c0_21, %c0_22] : memref<8x128xf32, #tpu.memory_space<vmem>>, vector<8x128xf32>
      tpu.vector_store %arg5[%c0_21, %c0_22], %28 {strides = array<i32>} : memref<8x128xf32, #tpu.memory_space<vmem>>, vector<8x128xf32>,
    }
    %c8_i32_6 = arith.constant 8 : i32
    return
  }
  func.func @transform_0(%arg0: i32) -> (i32, i32, i32) {
    %c0_i32 = arith.constant 0 : i32
    %c0_i32_0 = arith.constant 0 : i32
    %c0_i32_1 = arith.constant 0 : i32
    return %c0_i32, %arg0, %c0_i32_0 : i32, i32, i32
  }
  func.func @transform_1(%arg0: i32) -> (i32, i32) {
    %c0_i32 = arith.constant 0 : i32
    %c0_i32_0 = arith.constant 0 : i32
    %c0_i32_1 = arith.constant 0 : i32
    return %c0_i32, %c0_i32_0 : i32, i32
  }
  func.func @transform_2(%arg0: i32) -> (i32, i32, i32) {
    %c0_i32 = arith.constant 0 : i32
    %c0_i32_0 = arith.constant 0 : i32
    %c0_i32_1 = arith.constant 0 : i32
    return %c0_i32, %arg0, %c0_i32_0 : i32, i32, i32
  }
  func.func @transform_3(%arg0: i32) -> (i32, i32) {
    %c0_i32 = arith.constant 0 : i32
    %c0_i32_0 = arith.constant 0 : i32
    return %arg0, %c0_i32 : i32, i32
  }
  func.func @transform_4(%arg0: i32) -> (i32, i32) {
    %c0_i32 = arith.constant 0 : i32
    %c0_i32_0 = arith.constant 0 : i32
    return %arg0, %c0_i32 : i32, i32
  }
}

</mosaic_0001>

<bundles_post_ra>
// kernel: tpu_custom_call.1
= control target key start
LH: loop header
LB: loop body
LE: loop exit
PB: predicated region body
PF: predicated region fallthrough
CT: control target
= control target key end

     0   :  { %10 = vsyncpa [#allocation3], 0  ;;  %s765_s0 = inlined_call_operand.hbm [shape: f32[8,8,512], index: 0, kind: input, shape index: {}]   ;;  %s766_s1 = inlined_call_operand.hbm [shape: f32[128,512], index: 1, kind: input, shape index: {}]   ;;  %s767_s2 = inlined_call_operand.hbm [shape: f32[8,8,128], index: 2, kind: output, shape index: {0}]   ;;  %s768_s3 = inlined_call_operand.hbm [shape: f32[8,128], index: 3, kind: output, shape index: {1}]   ;;  %s769_s4 = inlined_call_operand.hbm [shape: f32[8,128], index: 4, kind: output, shape index: {2}]  }
   0x1   :  { %11 = vsyncpa [#allocation6], 0 }
   0x2   :  { %12 = vsyncpa [#allocation4], 0 }
   0x3   :  { %13 = vsyncpa [#allocation9], 0  ;;  %s512_s15 = smov [#allocation2]  }
   0x4   :  { %s19_s16 = sshll.u32 %s512_s15, 4  ;;  %s20_s16 = int_to_ptr.vmem [resolvable:$true] %s19_s16 }
   0x5   :  { %s404_s17 = scalar_lea.vmem %s20_s16, 4096  ;;  %p409_p1 = scmp.lt.s32.totalorder %s20_s16, %s20_s16 }
   0x6   :  { %p405_p0 = scmp.ne.s32.totalorder %s20_s16, %s404_s17  ;;  %p410_p2 = scmp.lt.s32.totalorder %s404_s17, %s404_s17 }
   0x8   :  { %p411_p3 = por %p410_p2, %p409_p1 }
   0xa   :  { %p412_p4 = pnand %p411_p3, %p405_p0 }
   0xc   :  { %415 = shalt.err (!%p412_p4)
}
   0xd   :  { %s513_s18 = smov 512   ;;  %s514_s19 = smov 32  }
   0xe   :  { %25 = dma.hbm_to_vmem [thread:$0]  %s765_s0, 4096, %s20_s16, [#allocation3], %s513_s18, %s513_s18, %s514_s19  }
   0xf   :  { %s515_s22 = smov [#allocation5]  }
  0x10   :  { %s31_s23 = sshll.u32 %s515_s22, 4  ;;  %s32_s23 = int_to_ptr.vmem [resolvable:$true] %s31_s23 }
  0x11   :  { %s424_s24 = scalar_lea.vmem %s32_s23, 8192  ;;  %p429_p6 = scmp.lt.s32.totalorder %s32_s23, %s32_s23 }
  0x12   :  { %p425_p5 = scmp.ne.s32.totalorder %s32_s23, %s424_s24  ;;  %p430_p7 = scmp.lt.s32.totalorder %s424_s24, %s424_s24 }
  0x14   :  { %p431_p8 = por %p430_p7, %p429_p6 }
  0x16   :  { %p432_p9 = pnand %p431_p8, %p425_p5 }
  0x18   :  { %435 = shalt.err (!%p432_p9)
}
  0x19   :  { %37 = dma.hbm_to_vmem [thread:$0]  %s766_s1, 8192, %s32_s23, [#allocation6], %s513_s18, %s513_s18, %s514_s19  }
  0x1a   :  { %500 = dma.done.wait [#allocation3], 4096  }
  0x1b   :  { %501 = vsyncadd [#allocation3], 4294963200 }
  0x1c   :  { %502 = dma.done.wait [#allocation6], 8192  }
  0x1d   :  { %503 = vsyncadd [#allocation6], 4294959104  ;;  %v516_v0 = vmov 0.0   ;;  %v554_v1 = vld [vmem:[#allocation5] sm:$0xff]  ;;  %v556_v2 = vld [vmem:[#allocation5 + $0x8] sm:$0xff]  ;;  %s682_s0 = smov 0  }
  0x1e   :  { %108 = vst [vmem:[#allocation8] sm:$0xff] %v516_v0  ;;  %109 = vst [vmem:[#allocation10] sm:$0xff] %v516_v0  ;;  %v558_v3 = vld [vmem:[#allocation5 + $0x10] sm:$0xff]  ;;  %v560_v4 = vld [vmem:[#allocation5 + $0x18] sm:$0xff] }
  0x1f   :  { %770 = vst [vmem:[#allocation15_spill] sm:$0xff] %v554_v1  ;;  %771 = vst [vmem:[#allocation16_spill] sm:$0xff] %v556_v2  ;;  %v562_v5 = vld [vmem:[#allocation5 + $0x20] sm:$0xff]  ;;  %v564_v6 = vld [vmem:[#allocation5 + $0x28] sm:$0xff] }
  0x20   :  { %772 = vst [vmem:[#allocation17_spill] sm:$0xff] %v558_v3  ;;  %773 = vst [vmem:[#allocation18_spill] sm:$0xff] %v560_v4  ;;  %v566_v7 = vld [vmem:[#allocation5 + $0x30] sm:$0xff]  ;;  %v568_v8 = vld [vmem:[#allocation5 + $0x38] sm:$0xff] }
  0x21   :  { %774 = vst [vmem:[#allocation19_spill] sm:$0xff] %v562_v5  ;;  %775 = vst [vmem:[#allocation20_spill] sm:$0xff] %v564_v6  ;;  %v570_v9 = vld [vmem:[#allocation5 + $0x40] sm:$0xff]  ;;  %v572_v10 = vld [vmem:[#allocation5 + $0x48] sm:$0xff] }
  0x22   :  { %776 = vst [vmem:[#allocation21_spill] sm:$0xff] %v566_v7  ;;  %777 = vst [vmem:[#allocation22_spill] sm:$0xff] %v568_v8  ;;  %v574_v11 = vld [vmem:[#allocation5 + $0x50] sm:$0xff]  ;;  %v576_v12 = vld [vmem:[#allocation5 + $0x58] sm:$0xff] }
  0x23   :  { %778 = vst [vmem:[#allocation23_spill] sm:$0xff] %v570_v9  ;;  %779 = vst [vmem:[#allocation24_spill] sm:$0xff] %v572_v10  ;;  %v578_v13 = vld [vmem:[#allocation5 + $0x60] sm:$0xff]  ;;  %v580_v14 = vld [vmem:[#allocation5 + $0x68] sm:$0xff] }
  0x24   :  { %780 = vst [vmem:[#allocation25_spill] sm:$0xff] %v574_v11  ;;  %781 = vst [vmem:[#allocation26_spill] sm:$0xff] %v576_v12  ;;  %v582_v15 = vld [vmem:[#allocation5 + $0x70] sm:$0xff]  ;;  %v584_v16 = vld [vmem:[#allocation5 + $0x78] sm:$0xff] }
  0x25   :  { %782 = vst [vmem:[#allocation27_spill] sm:$0xff] %v578_v13  ;;  %783 = vst [vmem:[#allocation28_spill] sm:$0xff] %v580_v14  ;;  %v586_v17 = vld [vmem:[#allocation5 + $0x80] sm:$0xff]  ;;  %v588_v18 = vld [vmem:[#allocation5 + $0x88] sm:$0xff] }
  0x26   :  { %784 = vst [vmem:[#allocation29_spill] sm:$0xff] %v582_v15  ;;  %785 = vst [vmem:[#allocation30_spill] sm:$0xff] %v584_v16  ;;  %v590_v19 = vld [vmem:[#allocation5 + $0x90] sm:$0xff]  ;;  %v592_v20 = vld [vmem:[#allocation5 + $0x98] sm:$0xff] }
  0x27   :  { %786 = vst [vmem:[#allocation31_spill] sm:$0xff] %v586_v17  ;;  %v594_v21 = vld [vmem:[#allocation5 + $0xa0] sm:$0xff]  ;;  %v596_v22 = vld [vmem:[#allocation5 + $0xa8] sm:$0xff]  ;;  %v598_v23 = vld [vmem:[#allocation5 + $0xb0] sm:$0xff] }
  0x28   :  { %v600_v24 = vld [vmem:[#allocation5 + $0xb8] sm:$0xff]  ;;  %v602_v25 = vld [vmem:[#allocation5 + $0xc0] sm:$0xff]  ;;  %v604_v26 = vld [vmem:[#allocation5 + $0xc8] sm:$0xff] }
  0x29   :  { %v606_v27 = vld [vmem:[#allocation5 + $0xd0] sm:$0xff]  ;;  %v608_v28 = vld [vmem:[#allocation5 + $0xd8] sm:$0xff]  ;;  %v610_v29 = vld [vmem:[#allocation5 + $0xe0] sm:$0xff] }
  0x2a   :  { %v612_v30 = vld [vmem:[#allocation5 + $0xe8] sm:$0xff]  ;;  %v614_v31 = vld [vmem:[#allocation5 + $0xf0] sm:$0xff]  ;;  %v616_v32 = vld [vmem:[#allocation5 + $0xf8] sm:$0xff] }
  0x2b   :  { %v618_v33 = vld [vmem:[#allocation5 + $0x100] sm:$0xff]  ;;  %v620_v34 = vld [vmem:[#allocation5 + $0x108] sm:$0xff]  ;;  %v622_v35 = vld [vmem:[#allocation5 + $0x110] sm:$0xff] }
  0x2c   :  { %v624_v36 = vld [vmem:[#allocation5 + $0x118] sm:$0xff]  ;;  %v626_v37 = vld [vmem:[#allocation5 + $0x120] sm:$0xff]  ;;  %v628_v38 = vld [vmem:[#allocation5 + $0x128] sm:$0xff] }
  0x2d   :  { %v630_v39 = vld [vmem:[#allocation5 + $0x130] sm:$0xff]  ;;  %v632_v40 = vld [vmem:[#allocation5 + $0x138] sm:$0xff]  ;;  %v634_v41 = vld [vmem:[#allocation5 + $0x140] sm:$0xff] }
  0x2e   :  { %v636_v42 = vld [vmem:[#allocation5 + $0x148] sm:$0xff]  ;;  %v638_v43 = vld [vmem:[#allocation5 + $0x150] sm:$0xff]  ;;  %v640_v44 = vld [vmem:[#allocation5 + $0x158] sm:$0xff] }
  0x2f   :  { %v642_v45 = vld [vmem:[#allocation5 + $0x160] sm:$0xff]  ;;  %v644_v46 = vld [vmem:[#allocation5 + $0x168] sm:$0xff]  ;;  %v646_v47 = vld [vmem:[#allocation5 + $0x170] sm:$0xff] }
  0x30   :  { %v648_v48 = vld [vmem:[#allocation5 + $0x178] sm:$0xff]  ;;  %v650_v49 = vld [vmem:[#allocation5 + $0x180] sm:$0xff]  ;;  %v652_v50 = vld [vmem:[#allocation5 + $0x188] sm:$0xff] }
  0x31   :  { %v654_v51 = vld [vmem:[#allocation5 + $0x190] sm:$0xff]  ;;  %v656_v52 = vld [vmem:[#allocation5 + $0x198] sm:$0xff]  ;;  %v658_v53 = vld [vmem:[#allocation5 + $0x1a0] sm:$0xff] }
  0x32   :  { %v660_v54 = vld [vmem:[#allocation5 + $0x1a8] sm:$0xff]  ;;  %v662_v55 = vld [vmem:[#allocation5 + $0x1b0] sm:$0xff]  ;;  %v664_v56 = vld [vmem:[#allocation5 + $0x1b8] sm:$0xff] }
  0x33   :  { %v666_v57 = vld [vmem:[#allocation5 + $0x1c0] sm:$0xff]  ;;  %v668_v58 = vld [vmem:[#allocation5 + $0x1c8] sm:$0xff]  ;;  %v670_v59 = vld [vmem:[#allocation5 + $0x1d0] sm:$0xff] }
  0x34   :  { %v672_v60 = vld [vmem:[#allocation5 + $0x1d8] sm:$0xff]  ;;  %v674_v61 = vld [vmem:[#allocation5 + $0x1e0] sm:$0xff]  ;;  %v676_v62 = vld [vmem:[#allocation5 + $0x1e8] sm:$0xff] }
  0x35   :  { %v678_v63 = vld [vmem:[#allocation5 + $0x1f0] sm:$0xff]  ;;  %v680_v0 = vld [vmem:[#allocation5 + $0x1f8] sm:$0xff] }
  0x36   :  { %787 = vst [vmem:[#allocation32_spill] sm:$0xff] %v680_v0 }
  0x37 LB: > { %125 = vmatprep.subr.mxu0 %v676_v62  ;;  %v789_v17 = vld [vmem:[#allocation31_spill] sm:$0xff]  ;;  %v790_v14 = vld [vmem:[#allocation28_spill] sm:$0xff]  ;;  %v792_v16 = vld [vmem:[#allocation30_spill] sm:$0xff]  ;;  %s360_s1 = sshll.u32 %s510_s0, 5  ;;  %s359_s28 = sshll.u32 %s510_s0, 3  ;;  %s510_s0 = sphi %s682_s0, %s115_s0  }
  0x38   : > { %126 = vmatpush1.msra.mxu0 %v674_v61  ;;  %v791_v13 = vld [vmem:[#allocation27_spill] sm:$0xff]  ;;  %v793_v10 = vld [vmem:[#allocation24_spill] sm:$0xff]  ;;  %v794_v15 = vld [vmem:[#allocation29_spill] sm:$0xff]  ;;  %s120_s27 = scalar_lea.vmem [#allocation2], %s360_s1  ;;  %s296_s29 = scalar_lea.vmem [#allocation7], %s359_s28 }
  0x39   : > { %127 = vmatprep.subr.mxu0 %v668_v58  ;;  %v795_v9 = vld [vmem:[#allocation23_spill] sm:$0xff]  ;;  %v796_v12 = vld [vmem:[#allocation26_spill] sm:$0xff]  ;;  %v797_v6 = vld [vmem:[#allocation20_spill] sm:$0xff]  ;;  %s115_s0 = sadd.s32 1, %s510_s0  }
  0x3a   : > { %128 = vmatpush1.msra.mxu0 %v666_v57  ;;  %v798_v11 = vld [vmem:[#allocation25_spill] sm:$0xff]  ;;  %v799_v5 = vld [vmem:[#allocation19_spill] sm:$0xff]  ;;  %v800_v8 = vld [vmem:[#allocation22_spill] sm:$0xff]  ;;  %p112_p10 = scmp.ge.s32.totalorder %s115_s0, 8  }
  0x3b   : > { %129 = vmatprep.subr.mxu0 %v660_v54  ;;  %v801_v2 = vld [vmem:[#allocation16_spill] sm:$0xff]  ;;  %v802_v7 = vld [vmem:[#allocation21_spill] sm:$0xff]  ;;  %v803_v1 = vld [vmem:[#allocation15_spill] sm:$0xff]  ;;  %s518_s30 = smov (%p112_p10), [#allocation8]   ;;  %s519_s6 = smov (%p112_p10), [#allocation7]  }
  0x3c   : > { %130 = vmatpush1.msra.mxu0 %v658_v53  ;;  %v804_v4 = vld [vmem:[#allocation18_spill] sm:$0xff]  ;;  %v805_v3 = vld [vmem:[#allocation17_spill] sm:$0xff]  ;;  %s318_s5 = sshll.u32 (%p112_p10), %s518_s30, 4  ;;  %s305_s7 = sshll.u32 (%p112_p10), %s519_s6, 4  ;;  %s319_s5 = int_to_ptr.vmem [resolvable:$true] %s318_s5  ;;  %s306_s7 = int_to_ptr.vmem [resolvable:$true] %s305_s7 }
  0x3d   : > { %v788_v0 = vld [vmem:[#allocation32_spill] sm:$0xff]  ;;  %131 = vmatprep.subr.mxu0 %v652_v50  ;;  %s436_s8 = scalar_lea.vmem (%p112_p10), %s319_s5, 128  ;;  %p441_p12 = scmp.lt.s32.totalorder (%p112_p10), %s319_s5, %s319_s5 }
  0x3e   : > { %196 = vmatprep.subr.mxu1 %v788_v0  ;;  %132 = vmatpush1.msra.mxu0 %v650_v49  ;;  %v517_v0 = vmov 0.0   ;;  %p437_p11 = scmp.ne.s32.totalorder (%p112_p10), %s319_s5, %s436_s8  ;;  %p442_p13 = scmp.lt.s32.totalorder (%p112_p10), %s436_s8, %s436_s8 }
  0x3f   : > { %197 = vmatpush1.msra.mxu1 %v678_v63  ;;  %133 = vmatprep.subr.mxu0 %v644_v46 }
  0x40   : > { %198 = vmatprep.subr.mxu1 %v672_v60  ;;  %134 = vmatpush1.msra.mxu0 %v642_v45  ;;  %p443_p0 = por (%p112_p10), %p442_p13, %p441_p12 }
  0x41   : > { %199 = vmatpush1.msra.mxu1 %v670_v59  ;;  %135 = vmatprep.subr.mxu0 %v636_v42 }
  0x42   : > { %200 = vmatprep.subr.mxu1 %v664_v56  ;;  %136 = vmatpush1.msra.mxu0 %v634_v41  ;;  %p444_p1 = pnand (%p112_p10), %p443_p0, %p437_p11 }
  0x43   : > { %201 = vmatpush1.msra.mxu1 %v662_v55  ;;  %137 = vmatprep.subr.mxu0 %v628_v38 }
  0x44   : > { %202 = vmatprep.subr.mxu1 %v656_v52  ;;  %138 = vmatpush1.msra.mxu0 %v626_v37 }
  0x45   : > { %203 = vmatpush1.msra.mxu1 %v654_v51  ;;  %139 = vmatprep.subr.mxu0 %v620_v34 }
  0x46   : > { %204 = vmatprep.subr.mxu1 %v648_v48  ;;  %140 = vmatpush1.msra.mxu0 %v618_v33 }
  0x47   : > { %205 = vmatpush1.msra.mxu1 %v646_v47  ;;  %189 = vmatprep.mubr.f32.mxu0 %v517_v0 }
  0x48   : > { %206 = vmatprep.subr.mxu1 %v640_v44  ;;  %141 = vmatprep.subr.mxu0 %v612_v30 }
  0x49   : > { %207 = vmatpush1.msra.mxu1 %v638_v43  ;;  %142 = vmatpush1.msra.mxu0 %v610_v29 }
  0x4a   : > { %208 = vmatprep.subr.mxu1 %v632_v40  ;;  %143 = vmatprep.subr.mxu0 %v604_v26 }
  0x4b   : > { %209 = vmatpush1.msra.mxu1 %v630_v39  ;;  %144 = vmatpush1.msra.mxu0 %v602_v25 }
  0x4c   : > { %210 = vmatprep.subr.mxu1 %v624_v36  ;;  %145 = vmatprep.subr.mxu0 %v596_v22 }
  0x4d   : > { %211 = vmatpush1.msra.mxu1 %v622_v35  ;;  %146 = vmatpush1.msra.mxu0 %v594_v21 }
  0x4e   : > { %212 = vmatprep.subr.mxu1 %v616_v32  ;;  %147 = vmatprep.subr.mxu0 %v588_v18 }
  0x4f   : > { %213 = vmatpush1.msra.mxu1 %v614_v31  ;;  %148 = vmatpush1.msra.mxu0 %v789_v17 }
  0x50   : > { %214 = vmatprep.subr.mxu1 %v608_v28  ;;  %149 = vmatprep.subr.mxu0 %v790_v14  ;;  %v116_v14 = vld [vmem:[#allocation8] sm:$0xff] }
  0x51   : > { %215 = vmatpush1.msra.mxu1 %v606_v27  ;;  %150 = vmatpush1.msra.mxu0 %v791_v13  ;;  %v124_v13 = vld [vmem:[%s120_s27 + $0x18] sm:$0xff] }
  0x52   : > { %216 = vmatprep.subr.mxu1 %v600_v24  ;;  %151 = vmatprep.subr.mxu0 %v793_v10 }
  0x53   : > { %217 = vmatpush1.msra.mxu1 %v598_v23  ;;  %152 = vmatpush1.msra.mxu0 %v795_v9  ;;  %v122_v9 = vld [vmem:[%s120_s27 + $0x8] sm:$0xff] }
  0x54   : > { %218 = vmatprep.subr.mxu1 %v592_v20  ;;  %153 = vmatprep.subr.mxu0 %v797_v6  ;;  %v121_v6 = vld [vmem:[%s120_s27] sm:$0xff] }
  0x55   : > { %219 = vmatpush1.msra.mxu1 %v590_v19  ;;  %154 = vmatpush1.msra.mxu0 %v799_v5 }
  0x56   : > { %220 = vmatprep.subr.mxu1 %v792_v16  ;;  %155 = vmatprep.subr.mxu0 %v801_v2 }
  0x57   : > { %221 = vmatpush1.msra.mxu1 %v794_v15  ;;  %156 = vmatpush1.msra.mxu0 %v803_v1  ;;  %v123_v1 = vld [vmem:[%s120_s27 + $0x10] sm:$0xff] }
  0x58   : > { %222 = vmatprep.subr.mxu1 %v796_v12  ;;  %190 = vmatmul.mubr.f32.vlgmr.msra.gmra.mxu0 %v116_v14 }
  0x59   : > { %223 = vmatpush1.msra.mxu1 %v798_v11  ;;  %260 = vmatprep.mubr.f32.mxu1 %v517_v0 }
  0x5a   : > { %224 = vmatprep.subr.mxu1 %v800_v8 }
  0x5b   : > { %225 = vmatpush1.msra.mxu1 %v802_v7 }
  0x5c   : > { %226 = vmatprep.subr.mxu1 %v804_v4 }
  0x5d   : > { %227 = vmatpush1.msra.mxu1 %v805_v3 }
  0x5e   : > { %261 = vmatmul.mubr.f32.vlgmr.msra.gmra.mxu1 %v116_v14 }
 0x118   : > { %v191_v5 = vpop.f32.mrf.mxu0 }
 0x119   : > { %v267_v10 = vadd.f32 %v191_v5, %v121_v6 }
 0x11a   : > { %v193_v8 = vpop.f32.mrf.mxu0 }
 0x11b   : > { %v356_v11 = vmul.f32 -1.442695, %v267_v10  ;;  %v268_v2 = vadd.f32 %v193_v8, %v122_v9 }
 0x11d   : > { %380 = vpow2.f32 %v356_v11  ;;  %v357_v7 = vmul.f32 -1.442695, %v268_v2 }
 0x11e   : > { %v262_v12 = vpop.f32.mrf.mxu1 }
 0x11f   : > { %382 = vpow2.f32 %v357_v7  ;;  %v269_v4 = vadd.f32 %v262_v12, %v123_v1  ;;  %v117_v7 = vld [vmem:[#allocation10] sm:$0xff] }
 0x120   : > { %v264_v15 = vpop.f32.mrf.mxu1 }
 0x121   : > { %v358_v3 = vmul.f32 -1.442695, %v269_v4  ;;  %v270_v0 = vadd.f32 %v264_v15, %v124_v13 }
 0x123   : > { %384 = vpow2.f32 %v358_v3 }
 0x124   : > { %386 = vtanh.f32 %v270_v0 }
 0x12a   : > { %v381_v14 = vpop.eup %380 }
 0x12b   : > { %v280_v16 = vadd.f32 1.0, %v381_v14 }
 0x12c   : > { %v383_v17 = vpop.eup %382 }
 0x12d   : > { %388 = vrcp.f32 %v280_v16  ;;  %v281_v5 = vadd.f32 1.0, %v383_v17 }
 0x12f   : > { %390 = vrcp.f32 %v281_v5 }
 0x130   : > { %v385_v6 = vpop.eup %384 }
 0x131   : > { %v387_v8 = vpop.eup %386  ;;  %v282_v10 = vadd.f32 1.0, %v385_v6 }
 0x133   : > { %392 = vrcp.f32 %v282_v10 }
 0x13a   : > { %v389_v2 = vpop.eup %388 }
 0x13b   : > { %v291_v11 = vmul.f32 %v389_v2, %v387_v8 }
 0x13c   : > { %v391_v9 = vpop.eup %390 }
 0x13d   : > { %v290_v1 = vmul.f32 %v391_v9, %v117_v7 }
 0x13f   : > { %v292_v12 = vadd.f32 %v291_v11, %v290_v1 }
 0x140   : > { %v393_v3 = vpop.eup %392 }
 0x141   : > { %394 = vtanh.f32 %v292_v12  ;;  %299 = vst [vmem:[#allocation10] sm:$0xff] %v292_v12 }
 0x14d   :  { %114 = sbr.rel (!%p112_p10) target bundleno = 55 (0x37), region = 61 }
 0x14e   : > { %v395_v4 = vpop.eup %394 }
 0x14f   : > { %v294_v13 = vmul.f32 %v395_v4, %v393_v3 }
 0x151   : > { %297 = vst [vmem:[%s296_s29] sm:$0xff] %v294_v13  ;;  %298 = vst [vmem:[#allocation8] sm:$0xff] %v294_v13 }
 0x152   :  { %447 = shalt.err (!%p444_p1)
}
 0x153   :  { %321 = dma.vmem_to_hbm [thread:$0]  %s319_s5, 128, %s768_s3, [#allocation9]  }
 0x154   :  { %s456_s11 = scalar_lea.vmem %s306_s7, 1024  ;;  %p461_p3 = scmp.lt.s32.totalorder %s306_s7, %s306_s7 }
 0x155   :  { %p457_p2 = scmp.ne.s32.totalorder %s306_s7, %s456_s11  ;;  %p462_p4 = scmp.lt.s32.totalorder %s456_s11, %s456_s11 }
 0x157   :  { %p463_p5 = por %p462_p4, %p461_p3 }
 0x159   :  { %p464_p6 = pnand %p463_p5, %p457_p2 }
 0x15b   :  { %467 = shalt.err (!%p464_p6)
}
 0x15c   :  { %s520_s12 = smov 128   ;;  %s521_s13 = smov 8  }
 0x15d   :  { %311 = dma.vmem_to_hbm [thread:$0]  %s306_s7, 1024, %s767_s2, [#allocation4], %s520_s12, %s520_s12, %s521_s13  }
 0x15e   :  { %s522_s16 = smov [#allocation10]  }
 0x15f   :  { %s328_s17 = sshll.u32 %s522_s16, 4  ;;  %s329_s17 = int_to_ptr.vmem [resolvable:$true] %s328_s17 }
 0x160   :  { %s476_s18 = scalar_lea.vmem %s329_s17, 128  ;;  %p481_p8 = scmp.lt.s32.totalorder %s329_s17, %s329_s17 }
 0x161   :  { %p477_p7 = scmp.ne.s32.totalorder %s329_s17, %s476_s18  ;;  %p482_p9 = scmp.lt.s32.totalorder %s476_s18, %s476_s18 }
 0x163   :  { %p483_p10 = por %p482_p9, %p481_p8 }
 0x165   :  { %p484_p11 = pnand %p483_p10, %p477_p7 }
 0x167   :  { %487 = shalt.err (!%p484_p11)
}
 0x168   :  { %331 = dma.vmem_to_hbm [thread:$0]  %s329_s17, 128, %s769_s4, [#allocation9]  }
 0x169   :  { %504 = dma.done.wait [#allocation4], 1024  }
 0x16a   :  { %505 = vsyncadd [#allocation4], 4294966272 }
 0x16b   :  { %506 = dma.done.wait [#allocation9], 256  }
 0x16c   :  { %507 = vsyncadd [#allocation9], 4294967040 }
 0x16d   :  { %341 = vsyncpa [#allocation3], 1 }
 0x16e   :  { %342 = vsyncpa [#allocation6], 1 }
 0x16f   :  { %343 = vsyncpa [#allocation4], 1 }
 0x170   :  { %344 = vsyncpa [#allocation9], 1 }

</bundles_post_ra>
